<compile_context>
chip_gen: v7x
topology: tpu7x:2x2x1
jax: 0.10.0
libtpu: 0.0.40
codegen_flags: <defaults>
</compile_context>

<pallas_src>
import jax
import jax.numpy as jnp
from jax.experimental import pallas as pl
from jax.experimental.pallas import tpu as pltpu

WIDTH = 32   # width=32
DEPTH = 3    # depth=3 -> net1: Lin(4,W)+Tanh, 2x(Lin(W,W)+ReLU); net2: 2x(Lin(W,W)+ReLU), Lin(W,2)
_LANE = 128

# Fused weight-slab row layout (W = WIDTH):
#   rows [0   , 2W )  net1 layer1, block-diag, fin = 8   (= 2*4 input features)
#   rows [2W  , 4W )  net1 layer2, block-diag, fin = 2W
#   rows [4W  , 6W )  net1 layer3, block-diag, fin = 2W
#   rows [6W  , 7W )  net2 layer1,             fin = W
#   rows [7W  , 8W )  net2 layer2,             fin = W
#   rows [8W  , 8W+16) net2 layer3 (rows padded 2->16), fin = W
_SLAB_ROWS = 8 * WIDTH + 16      # 272
_SLAB_COLS = 2 * WIDTH + 1       # 65  (widest layer: block-diag (2W, 2W) + bias column)


def deepsets_kernel(x_ref, eps_ref, wb_ref, out_ref):
    W = WIDTH

    def affine(h, r0, rows, fin):
        # wb_ref is the fused bf16 slab; each layer is a static row-range [W | b | pad].
        wb = wb_ref[r0:r0 + rows, :]
        y = jnp.dot(wb[:, :fin], h.astype(jnp.bfloat16),
                    preferred_element_type=jnp.float32)          # (rows, bm) f32
        return y + wb[:, fin:fin + 1].astype(jnp.float32)        # bias add in f32

    x = x_ref[...]                      # (8, bm) f32: rows 0:4 = set-elem 0, rows 4:8 = set-elem 1
    eps = eps_ref[...]                  # (1, bm) f32

    # --- net1, both set elements at once via block-diagonal sublane stacking ---
    h = jnp.tanh(affine(x, 0, 2 * W, 8))                          # (2W, bm)
    h = jnp.maximum(affine(h, 2 * W, 2 * W, 2 * W), 0.0)
    h = jnp.maximum(affine(h, 4 * W, 2 * W, 2 * W), 0.0)

    # sum over the set dimension (size 2)
    x3 = h[:W, :] + h[W:, :]                                      # (W, bm)

    # --- net2 ---
    h = jnp.maximum(affine(x3, 6 * W, W, W), 0.0)
    h = jnp.maximum(affine(h, 7 * W, W, W), 0.0)
    p = affine(h, 8 * W, 16, W)                                   # (16, bm); rows 0,1 valid

    mu = p[0:1, :]
    logsig = p[1:2, :]
    out_ref[0:1, :] = mu + jnp.exp(logsig) * eps                  # sample
    out_ref[1:2, :] = -logsig - eps * eps * 0.5                   # logprob


def _num_tensorcores():
    """Best-effort TensorCore count (v7x has 2; v5e/v6e have 1). Defaults to 1."""
    try:
        info = pltpu.get_tpu_info()
    except Exception:
        return 1
    for attr in ("tensorcores_per_chip", "num_tensorcores", "num_cores", "cores_per_chip"):
        v = getattr(info, attr, None)
        if isinstance(v, int) and v > 0:
            return v
    return 1


def _choose_tile(B, block_b):
    """Pick a lane-aligned batch tile bm and padded batch Bp (Bp % bm == 0)."""
    bm = min(block_b, B)
    if bm >= _LANE:
        bm = (bm // _LANE) * _LANE                # lane-align the tile
        Bp = -(-B // bm) * bm                     # pad batch up to a tile multiple
        # Only force >= 2 grid steps on chips with 2 TensorCores (v7x megacore);
        # on single-TC v5e/v6e a forced split just halves the tile + adds a step.
        if _num_tensorcores() >= 2 and Bp // bm < 2 and bm >= 2 * _LANE:
            bm = max(_LANE, (bm // 2 // _LANE) * _LANE)
            Bp = -(-B // bm) * bm
    else:
        bm = B                                    # tiny batch: single full-extent tile
        Bp = B
    return bm, Bp


def _pack_weights(params):
    """Fuse all six layers into one (272, 65) bf16 slab (see row-layout comment above)."""
    (w10, b10), (w11, b11), (w12, b12), (w20, b20), (w21, b21), (w22, b22) = params

    def blockdiag(w, b):
        z = jnp.zeros_like(w)
        wbd = jnp.concatenate([jnp.concatenate([w, z], axis=1),
                               jnp.concatenate([z, w], axis=1)], axis=0)   # (2o, 2i)
        bbd = jnp.concatenate([b, b])                                      # (2o,)
        return jnp.concatenate([wbd, bbd[:, None]], axis=1)                # (2o, 2i+1)

    def plain(w, b, pad_rows=None):
        wb = jnp.concatenate([w, b[:, None]], axis=1)
        if pad_rows is not None and wb.shape[0] < pad_rows:
            wb = jnp.pad(wb, ((0, pad_rows - wb.shape[0]), (0, 0)))
        return wb

    slabs = [blockdiag(w10, b10),          # (2W, 2*4+1)
             blockdiag(w11, b11),          # (2W, 2W+1)
             blockdiag(w12, b12),          # (2W, 2W+1)
             plain(w20, b20),              # (W, W+1)
             plain(w21, b21),              # (W, W+1)
             plain(w22, b22, pad_rows=16)]  # (16, W+1)  (rows 2:16 zero, outputs unused)

    slabs = [jnp.pad(s, ((0, 0), (0, _SLAB_COLS - s.shape[1]))) for s in slabs]
    fused = jnp.concatenate(slabs, axis=0)
    assert fused.shape == (_SLAB_ROWS, _SLAB_COLS)
    return fused.astype(jnp.bfloat16)


def deepsets_forward(x, eps, params, block_b=2048):
    """x: (B, 2, 4) f32, eps: (B,) f32. Returns (sample, logprob), each (B,)."""
    B = x.shape[0]
    assert x.shape[1:] == (2, 4)

    bm, Bp = _choose_tile(B, block_b)
    grid = (Bp // bm,)

    # Lane-dense feature slab (8, Bp): rows 0:4 = set-elem-0 features, rows 4:8 = set-elem-1.
    feats = jnp.transpose(x.astype(jnp.float32), (1, 2, 0)).reshape(8, B)
    eps_row = eps.astype(jnp.float32)[None, :]
    if Bp > B:
        feats = jnp.pad(feats, ((0, 0), (0, Bp - B)))
        eps_row = jnp.pad(eps_row, ((0, 0), (0, Bp - B)))

    wb = _pack_weights(params)

    out = pl.pallas_call(
        deepsets_kernel,
        out_shape=jax.ShapeDtypeStruct((2, Bp), jnp.float32),
        grid_spec=pltpu.PrefetchScalarGridSpec(
            num_scalar_prefetch=0,
            grid=grid,
            in_specs=[pl.BlockSpec((8, bm), lambda i: (0, i)),        # batched features
                      pl.BlockSpec((1, bm), lambda i: (0, i)),        # batched eps
                      pl.BlockSpec(wb.shape, lambda i: (0, 0))],      # fused weights, replicated
            out_specs=pl.BlockSpec((2, bm), lambda i: (0, i)),
        ),
        compiler_params=pltpu.CompilerParams(
            dimension_semantics=("parallel",),
            vmem_limit_bytes=48 * 1024 * 1024,   # fits v7x's 64 MiB/TC with headroom
        ),
    )(feats, eps_row, wb)

    return out[0, :B], out[1, :B]


def init_params(key, width=WIDTH):
    """Deterministic synthetic parameters, PyTorch convention: weight (out, in), bias (out,)."""
    ks = jax.random.split(key, 12)

    def lin(kw, kb, fin, fout):
        w = jax.random.normal(kw, (fout, fin), jnp.float32) * 0.1
        b = jax.random.normal(kb, (fout,), jnp.float32) * 0.1
        return (w, b)

    return [lin(ks[0], ks[1], 4, width),      # net1[0]: Linear(4, W)
            lin(ks[2], ks[3], width, width),  # net1[2]: Linear(W, W)
            lin(ks[4], ks[5], width, width),  # net1[4]: Linear(W, W)
            lin(ks[6], ks[7], width, width),  # net2[0]: Linear(W, W)
            lin(ks[8], ks[9], width, width),  # net2[2]: Linear(W, W)
            lin(ks[10], ks[11], width, 2)]    # net2[4]: Linear(W, 2)


def deepsets_forward_ref(x, eps, params):
    """Pure-JAX f32 reference matching the PyTorch forward semantics."""
    (w10, b10), (w11, b11), (w12, b12), (w20, b20), (w21, b21), (w22, b22) = params
    h = jnp.tanh(x @ w10.T + b10)                 # (B, 2, W)
    h = jnp.maximum(h @ w11.T + b11, 0.0)
    h = jnp.maximum(h @ w12.T + b12, 0.0)
    x3 = jnp.sum(h, axis=1)                       # (B, W)
    h = jnp.maximum(x3 @ w20.T + b20, 0.0)
    h = jnp.maximum(h @ w21.T + b21, 0.0)
    p = h @ w22.T + b22                           # (B, 2)
    mu, logsig = p[:, 0], p[:, 1]
    return mu + jnp.exp(logsig) * eps, -logsig - eps ** 2 / 2


if __name__ == "__main__":
    key = jax.random.PRNGKey(0)
    kx, keps, kp, kx2, keps2 = jax.random.split(key, 5)
    params = init_params(kp)

    # Main case: lane-aligned tiling (bm=128), batch padding (192 -> 256), 2-step grid.
    batch = 192
    x = jax.random.normal(kx, (batch, 2, 4), jnp.float32)
    eps = jax.random.normal(keps, (batch,), jnp.float32)
    smp, lp = deepsets_forward(x, eps, params)
    smp, lp = jax.block_until_ready((smp, lp))
    smp_ref, lp_ref = deepsets_forward_ref(x, eps, params)
    # bf16 MXU operands -> loosen tolerances vs the f32 reference.
    assert jnp.allclose(smp, smp_ref, atol=3e-2, rtol=3e-2)
    assert jnp.allclose(lp, lp_ref, atol=3e-2, rtol=3e-2)

    # Tiny-batch case: single full-extent tile path (degenerate, correctness only).
    batch2 = 2
    x2 = jax.random.normal(kx2, (batch2, 2, 4), jnp.float32)
    eps2 = jax.random.normal(keps2, (batch2,), jnp.float32)
    smp2, lp2 = jax.block_until_ready(deepsets_forward(x2, eps2, params))
    smp2_ref, lp2_ref = deepsets_forward_ref(x2, eps2, params)
    assert jnp.allclose(smp2, smp2_ref, atol=3e-2, rtol=3e-2)
    assert jnp.allclose(lp2, lp2_ref, atol=3e-2, rtol=3e-2)

    print("KERNEL_OK")
</pallas_src>

<mosaic_0001>
module attributes {stable_mosaic.version = 11 : i64} {
  func.func @deepsets_kernel(%arg0: i32, %arg1: memref<8x128xf32, #tpu.memory_space<vmem>>, %arg2: memref<1x128xf32, #tpu.memory_space<vmem>>, %arg3: memref<272x65xbf16, #tpu.memory_space<vmem>>, %arg4: memref<2x128xf32, #tpu.memory_space<vmem>>) attributes {dimension_semantics = [#tpu.dimension_semantics<parallel>], iteration_bounds = array<i64: 2>, scalar_prefetch = 0 : i64, scratch_operands = 0 : i64, tpu.core_type = #tpu.core_type<tc>, window_params = [{transform_indices = @transform_0, window_bounds = array<i64: 8, 128>}, {transform_indices = @transform_1, window_bounds = array<i64: 1, 128>}, {pipeline_mode = #tpu.pipeline_mode<synchronous>, transform_indices = @transform_2, window_bounds = array<i64: 272, 65>}, {transform_indices = @transform_3, window_bounds = array<i64: 2, 128>}]} {
    %c0 = arith.constant 0 : index
    %c0_0 = arith.constant 0 : index
    %0 = vector.load %arg1[%c0, %c0_0] : memref<8x128xf32, #tpu.memory_space<vmem>>, vector<8x128xf32>
    %c0_1 = arith.constant 0 : index
    %c0_2 = arith.constant 0 : index
    %1 = vector.load %arg2[%c0_1, %c0_2] : memref<1x128xf32, #tpu.memory_space<vmem>>, vector<1x128xf32>
    %c0_3 = arith.constant 0 : index
    %c0_4 = arith.constant 0 : index
    %2 = vector.load %arg3[%c0_3, %c0_4] : memref<272x65xbf16, #tpu.memory_space<vmem>>, vector<64x65xbf16>
    %3 = vector.extract_strided_slice %2 {offsets = [0, 0], sizes = [64, 8], strides = [1, 1]} : vector<64x65xbf16> to vector<64x8xbf16>
    %4 = arith.truncf %0 : vector<8x128xf32> to vector<8x128xbf16>
    %cst = arith.constant dense<0.000000e+00> : vector<64x128xf32>
    %5 = tpu.matmul %3, %4, %cst {dimension_numbers = #tpu.dot_dimension_numbers<[1], [0], [0], [1], [0, 0, 1, 1], [], []>} : vector<64x8xbf16>, vector<8x128xbf16>, vector<64x128xf32> -> vector<64x128xf32>
    %6 = vector.extract_strided_slice %2 {offsets = [0, 8], sizes = [64, 1], strides = [1, 1]} : vector<64x65xbf16> to vector<64x1xbf16>
    %7 = arith.extf %6 : vector<64x1xbf16> to vector<64x1xf32>
    %8 = vector.broadcast %7 : vector<64x1xf32> to vector<64x128xf32>
    %9 = arith.addf %5, %8 : vector<64x128xf32>
    %10 = math.tanh %9 : vector<64x128xf32>
    %c64 = arith.constant 64 : index
    %c0_5 = arith.constant 0 : index
    %11 = vector.load %arg3[%c64, %c0_5] : memref<272x65xbf16, #tpu.memory_space<vmem>>, vector<64x65xbf16>
    %12 = vector.extract_strided_slice %11 {offsets = [0, 0], sizes = [64, 64], strides = [1, 1]} : vector<64x65xbf16> to vector<64x64xbf16>
    %13 = arith.truncf %10 : vector<64x128xf32> to vector<64x128xbf16>
    %cst_6 = arith.constant dense<0.000000e+00> : vector<64x128xf32>
    %14 = tpu.matmul %12, %13, %cst_6 {dimension_numbers = #tpu.dot_dimension_numbers<[1], [0], [0], [1], [0, 0, 1, 1], [], []>} : vector<64x64xbf16>, vector<64x128xbf16>, vector<64x128xf32> -> vector<64x128xf32>
    %15 = vector.extract_strided_slice %11 {offsets = [0, 64], sizes = [64, 1], strides = [1, 1]} : vector<64x65xbf16> to vector<64x1xbf16>
    %16 = arith.extf %15 : vector<64x1xbf16> to vector<64x1xf32>
    %17 = vector.broadcast %16 : vector<64x1xf32> to vector<64x128xf32>
    %18 = arith.addf %14, %17 : vector<64x128xf32>
    %cst_7 = arith.constant 0.000000e+00 : f32
    %19 = vector.broadcast %cst_7 : f32 to vector<64x128xf32>
    %20 = arith.maximumf %18, %19 : vector<64x128xf32>
    %c128 = arith.constant 128 : index
    %c0_8 = arith.constant 0 : index
    %21 = vector.load %arg3[%c128, %c0_8] : memref<272x65xbf16, #tpu.memory_space<vmem>>, vector<64x65xbf16>
    %22 = vector.extract_strided_slice %21 {offsets = [0, 0], sizes = [64, 64], strides = [1, 1]} : vector<64x65xbf16> to vector<64x64xbf16>
    %23 = arith.truncf %20 : vector<64x128xf32> to vector<64x128xbf16>
    %cst_9 = arith.constant dense<0.000000e+00> : vector<64x128xf32>
    %24 = tpu.matmul %22, %23, %cst_9 {dimension_numbers = #tpu.dot_dimension_numbers<[1], [0], [0], [1], [0, 0, 1, 1], [], []>} : vector<64x64xbf16>, vector<64x128xbf16>, vector<64x128xf32> -> vector<64x128xf32>
    %25 = vector.extract_strided_slice %21 {offsets = [0, 64], sizes = [64, 1], strides = [1, 1]} : vector<64x65xbf16> to vector<64x1xbf16>
    %26 = arith.extf %25 : vector<64x1xbf16> to vector<64x1xf32>
    %27 = vector.broadcast %26 : vector<64x1xf32> to vector<64x128xf32>
    %28 = arith.addf %24, %27 : vector<64x128xf32>
    %cst_10 = arith.constant 0.000000e+00 : f32
    %29 = vector.broadcast %cst_10 : f32 to vector<64x128xf32>
    %30 = arith.maximumf %28, %29 : vector<64x128xf32>
    %31 = vector.extract_strided_slice %30 {offsets = [0, 0], sizes = [32, 128], strides = [1, 1]} : vector<64x128xf32> to vector<32x128xf32>
    %32 = vector.extract_strided_slice %30 {offsets = [32, 0], sizes = [32, 128], strides = [1, 1]} : vector<64x128xf32> to vector<32x128xf32>
    %33 = arith.addf %31, %32 : vector<32x128xf32>
    %c192 = arith.constant 192 : index
    %c0_11 = arith.constant 0 : index
    %34 = vector.load %arg3[%c192, %c0_11] : memref<272x65xbf16, #tpu.memory_space<vmem>>, vector<32x65xbf16>
    %35 = vector.extract_strided_slice %34 {offsets = [0, 0], sizes = [32, 32], strides = [1, 1]} : vector<32x65xbf16> to vector<32x32xbf16>
    %36 = arith.truncf %33 : vector<32x128xf32> to vector<32x128xbf16>
    %cst_12 = arith.constant dense<0.000000e+00> : vector<32x128xf32>
    %37 = tpu.matmul %35, %36, %cst_12 {dimension_numbers = #tpu.dot_dimension_numbers<[1], [0], [0], [1], [0, 0, 1, 1], [], []>} : vector<32x32xbf16>, vector<32x128xbf16>, vector<32x128xf32> -> vector<32x128xf32>
    %38 = vector.extract_strided_slice %34 {offsets = [0, 32], sizes = [32, 1], strides = [1, 1]} : vector<32x65xbf16> to vector<32x1xbf16>
    %39 = arith.extf %38 : vector<32x1xbf16> to vector<32x1xf32>
    %40 = vector.broadcast %39 : vector<32x1xf32> to vector<32x128xf32>
    %41 = arith.addf %37, %40 : vector<32x128xf32>
    %cst_13 = arith.constant 0.000000e+00 : f32
    %42 = vector.broadcast %cst_13 : f32 to vector<32x128xf32>
    %43 = arith.maximumf %41, %42 : vector<32x128xf32>
    %c224 = arith.constant 224 : index
    %c0_14 = arith.constant 0 : index
    %44 = vector.load %arg3[%c224, %c0_14] : memref<272x65xbf16, #tpu.memory_space<vmem>>, vector<32x65xbf16>
    %45 = vector.extract_strided_slice %44 {offsets = [0, 0], sizes = [32, 32], strides = [1, 1]} : vector<32x65xbf16> to vector<32x32xbf16>
    %46 = arith.truncf %43 : vector<32x128xf32> to vector<32x128xbf16>
    %cst_15 = arith.constant dense<0.000000e+00> : vector<32x128xf32>
    %47 = tpu.matmul %45, %46, %cst_15 {dimension_numbers = #tpu.dot_dimension_numbers<[1], [0], [0], [1], [0, 0, 1, 1], [], []>} : vector<32x32xbf16>, vector<32x128xbf16>, vector<32x128xf32> -> vector<32x128xf32>
    %48 = vector.extract_strided_slice %44 {offsets = [0, 32], sizes = [32, 1], strides = [1, 1]} : vector<32x65xbf16> to vector<32x1xbf16>
    %49 = arith.extf %48 : vector<32x1xbf16> to vector<32x1xf32>
    %50 = vector.broadcast %49 : vector<32x1xf32> to vector<32x128xf32>
    %51 = arith.addf %47, %50 : vector<32x128xf32>
    %cst_16 = arith.constant 0.000000e+00 : f32
    %52 = vector.broadcast %cst_16 : f32 to vector<32x128xf32>
    %53 = arith.maximumf %51, %52 : vector<32x128xf32>
    %c256 = arith.constant 256 : index
    %c0_17 = arith.constant 0 : index
    %54 = vector.load %arg3[%c256, %c0_17] : memref<272x65xbf16, #tpu.memory_space<vmem>>, vector<16x65xbf16>
    %55 = vector.extract_strided_slice %54 {offsets = [0, 0], sizes = [16, 32], strides = [1, 1]} : vector<16x65xbf16> to vector<16x32xbf16>
    %56 = arith.truncf %53 : vector<32x128xf32> to vector<32x128xbf16>
    %cst_18 = arith.constant dense<0.000000e+00> : vector<16x128xf32>
    %57 = tpu.matmul %55, %56, %cst_18 {dimension_numbers = #tpu.dot_dimension_numbers<[1], [0], [0], [1], [0, 0, 1, 1], [], []>} : vector<16x32xbf16>, vector<32x128xbf16>, vector<16x128xf32> -> vector<16x128xf32>
    %58 = vector.extract_strided_slice %54 {offsets = [0, 32], sizes = [16, 1], strides = [1, 1]} : vector<16x65xbf16> to vector<16x1xbf16>
    %59 = arith.extf %58 : vector<16x1xbf16> to vector<16x1xf32>
    %60 = vector.broadcast %59 : vector<16x1xf32> to vector<16x128xf32>
    %61 = arith.addf %57, %60 : vector<16x128xf32>
    %62 = vector.extract_strided_slice %61 {offsets = [0, 0], sizes = [1, 128], strides = [1, 1]} : vector<16x128xf32> to vector<1x128xf32>
    %63 = vector.extract_strided_slice %61 {offsets = [1, 0], sizes = [1, 128], strides = [1, 1]} : vector<16x128xf32> to vector<1x128xf32>
    %64 = math.exp %63 : vector<1x128xf32>
    %65 = arith.mulf %64, %1 : vector<1x128xf32>
    %66 = arith.addf %62, %65 : vector<1x128xf32>
    %c0_19 = arith.constant 0 : index
    %c0_20 = arith.constant 0 : index
    %67 = vector.load %arg4[%c0_19, %c0_20] : memref<2x128xf32, #tpu.memory_space<vmem>>, vector<1x128xf32>
    tpu.vector_store %arg4[%c0_19, %c0_20], %66 {strides = array<i32>} : memref<2x128xf32, #tpu.memory_space<vmem>>, vector<1x128xf32>,
    %cst_21 = arith.constant 0.000000e+00 : f32
    %68 = vector.broadcast %cst_21 : f32 to vector<1x128xf32>
    %69 = arith.subf %68, %63 : vector<1x128xf32>
    %70 = arith.mulf %1, %1 : vector<1x128xf32>
    %cst_22 = arith.constant 5.000000e-01 : f32
    %71 = vector.broadcast %cst_22 : f32 to vector<1x128xf32>
    %72 = arith.mulf %70, %71 : vector<1x128xf32>
    %73 = arith.subf %69, %72 : vector<1x128xf32>
    %c1 = arith.constant 1 : index
    %c0_23 = arith.constant 0 : index
    %74 = vector.load %arg4[%c1, %c0_23] : memref<2x128xf32, #tpu.memory_space<vmem>>, vector<1x128xf32>
    tpu.vector_store %arg4[%c1, %c0_23], %73 {strides = array<i32>} : memref<2x128xf32, #tpu.memory_space<vmem>>, vector<1x128xf32>,
    return
  }
  func.func @transform_0(%arg0: i32) -> (i32, i32) {
    %c0_i32 = arith.constant 0 : i32
    %c0_i32_0 = arith.constant 0 : i32
    return %c0_i32, %arg0 : i32, i32
  }
  func.func @transform_1(%arg0: i32) -> (i32, i32) {
    %c0_i32 = arith.constant 0 : i32
    %c0_i32_0 = arith.constant 0 : i32
    return %c0_i32, %arg0 : i32, i32
  }
  func.func @transform_2(%arg0: i32) -> (i32, i32) {
    %c0_i32 = arith.constant 0 : i32
    %c0_i32_0 = arith.constant 0 : i32
    %c0_i32_1 = arith.constant 0 : i32
    return %c0_i32, %c0_i32_0 : i32, i32
  }
  func.func @transform_3(%arg0: i32) -> (i32, i32) {
    %c0_i32 = arith.constant 0 : i32
    %c0_i32_0 = arith.constant 0 : i32
    return %c0_i32, %arg0 : i32, i32
  }
}

</mosaic_0001>

<bundles_post_ra>
// kernel: tpu_custom_call.1
= control target key start
LH: loop header
LB: loop body
LE: loop exit
PB: predicated region body
PF: predicated region fallthrough
CT: control target
= control target key end

     0   :  { %8 = vsyncpa [#allocation3], 0  ;;  %s1725_s0 = inlined_call_operand.vmem [shape: f32[8,256], index: 0, kind: input, shape index: {}]   ;;  %s1726_s1 = inlined_call_operand.vmem [shape: f32[1,256], index: 1, kind: input, shape index: {}]   ;;  %s1727_s2 = inlined_call_operand.vmem [shape: bf16[272,65], index: 2, kind: input, shape index: {}]   ;;  %s1728_s3 = inlined_call_operand.hbm [shape: f32[2,256], index: 3, kind: output, shape index: {}]  }
   0x1   :  { %10 = vsyncpa [#allocation3 + $0x1], 0  ;;  %s1501_s12 = smov 0   ;;  %s1503_s13 = smov 0  }
   0x2   :  { %s1505_s14 = smov 0   ;;  %s1507_s15 = smov 0  }
   0x3 LB: > { %s1522_s16 = sadd.s32 4294967295, %s1473_s15   ;;  %s1054_s17 = sadd.s32 4294967294, %s1473_s15   ;;  %s1473_s15 = sphi %s1507_s15, %s1734_s15   ;;  %s1469_s14 = sphi %s1505_s14, %s1733_s14   ;;  %s1465_s13 = sphi %s1503_s13, %s1732_s13   ;;  %s1461_s12 = sphi %s1501_s12, %s1731_s12  }
   0x4   : > { %s1526_s18 = sadd.s32 1, %s1473_s15   ;;  %s96_s19 = sadd.s32 1, %s1469_s14 }
   0x5   : > { %s93_s20 = ssub.s32 %s1473_s15, %s1526_s18  ;;  %p106_p0 = scmp.ne.s32.totalorder %s1469_s14, %s1465_s13 }
   0x6   : > { %p94_p1 = scmp.eq.s32.totalorder %s93_s20, 0  ;;  %p107_p2 = scmp.eq.s32.totalorder %s1522_s16, 1 }
   0x7   : > { %p112_p3 = scmp.ne.s32.totalorder %s1465_s13, %s1461_s12  ;;  %p113_p4 = scmp.eq.s32.totalorder %s1054_s17, 1 }
   0x8   : > { %s1537_s21 = scalar_select %p94_p1, %s1469_s14, %s96_s19  }
   0x9   : > { %p1539_p5 = por %p107_p2, %p106_p0  ;;  %p1543_p6 = por %p113_p4, %p112_p3 }
   0xa   : > { %p1057_p7 = scmp.ge.s32.totalorder %s1473_s15, 1  ;;  %p147_p8 = scmp.lt.s32.totalorder %s1473_s15, 3 }
   0xc   : > { %p148_p9 = pnand %p1057_p7, %p147_p8 }
   0xd   : > { %p173_p10 = scmp.lt.s32.totalorder (!%p148_p9), %s1522_s16, 1  ;;  %v183_v0 = vld [vmem:[%s1727_s2] sm:$0xff] (!%p148_p9)   ;;  %vm260_vm0 = vcmask (!%p148_p9), 64512   ;;  %v185_v1 = vld [vmem:[%s1727_s2 + $0x8] sm:$0xff] (!%p148_p9)   ;;  %v187_v2 = vld [vmem:[%s1727_s2 + $0x10] sm:$0xff] (!%p148_p9)   ;;  %v1475_v3 = vmov (!%p148_p9), 8  }
   0xe   : > { %151 = sbr.rel (%p148_p9) target bundleno = 1458 (0x5b2), region = 32  ;;  %1241 = vset.pattern.permute.xlu0 (!%p148_p9), %v1475_v3  ;;  %v192_v4 = vunpack.c.l.bf16 (!%p148_p9), %v183_v0  ;;  %v193_v5 = vunpack.c.h.bf16 (!%p148_p9), %v183_v0  ;;  %1252 = vset.pattern.permute.xlu1 (!%p148_p9), %v1475_v3  ;;  %v189_v6 = vld [vmem:[%s1727_s2 + $0x18] sm:$0xff] (!%p148_p9)   ;;  %v194_v7 = vunpack.c.l.bf16 (!%p148_p9), %v185_v1  ;;  %v195_v8 = vunpack.c.h.bf16 (!%p148_p9), %v185_v1  ;;  %v350_v20 = vld [vmem:[%s1727_s2 + $0x20] sm:$0xff] (!%p148_p9)   ;;  %v1580_v23 = vld [vmem:[%s1727_s2 + $0x28] sm:$0xff] (!%p148_p9)   ;;  %s170_s5 = sand.u32 (!%p148_p9), 1, %s1465_s13  }
   0xf   : > { %1132 = vmatprep.mubr.msk.bf16.mxu0 (!%p148_p9), %vm260_vm0, %v183_v0  ;;  %v196_v9 = vunpack.c.l.bf16 (!%p148_p9), %v187_v2  ;;  %v197_v10 = vunpack.c.h.bf16 (!%p148_p9), %v187_v2  ;;  %v198_v12 = vunpack.c.l.bf16 (!%p148_p9), %v189_v6  ;;  %v199_v13 = vunpack.c.h.bf16 (!%p148_p9), %v189_v6  ;;  %v1585_v24 = vld [vmem:[%s1727_s2 + $0x38] sm:$0xff] (!%p148_p9)   ;;  %v1590_v26 = vld [vmem:[%s1727_s2 + $0x50] sm:$0xff] (!%p148_p9)   ;;  %v1608_v37 = vld [vmem:[%s1727_s2 + $0x40] sm:$0xff] (!%p148_p9)   ;;  %s1095_s7 = sshll.u32 (!%p148_p9), %s1522_s16, 5  ;;  %s973_s17 = scalar_lea.sflag (!%p148_p9), [#allocation3], %s170_s5 }
  0x10   : > { %v1242_v11 = vpack.i.bf16 (!%p148_p9), %v193_v5, %v192_v4  ;;  %vm273_vm1 = vcmask (!%p148_p9), 1043456   ;;  %v1247_v16 = vpack.i.bf16 (!%p148_p9), %v195_v8, %v194_v7  ;;  %vm430_vm2 = vcmask (!%p148_p9), 523264   ;;  %v1595_v27 = vld [vmem:[%s1727_s2 + $0x30] sm:$0xff] (!%p148_p9)   ;;  %v1613_v40 = vld [vmem:[%s1727_s2 + $0x58] sm:$0xff] (!%p148_p9)   ;;  %v1622_v47 = vld [vmem:[%s1727_s2 + $0x48] sm:$0xff] (!%p148_p9)   ;;  %s1683_s11 = scalar_lea.hbm (!%p148_p9), %s1728_s3, %s1095_s7 }
  0x11   : > { %v1253_v14 = vpack.i.bf16 (!%p148_p9), %v197_v10, %v196_v9  ;;  %v1258_v18 = vpack.i.bf16 (!%p148_p9), %v199_v13, %v198_v12  ;;  %1148 = vmatprep.mubr.msk.bf16.mxu1 (!%p148_p9), %vm430_vm2, %v350_v20  ;;  %v362_v21 = vunpack.c.l.bf16 (!%p148_p9), %v350_v20  ;;  %v363_v22 = vunpack.c.h.bf16 (!%p148_p9), %v350_v20 }
  0x12   : > { %1243 = vperm.xlu0 (!%p148_p9), %1241, %v1242_v11   ;;  %v1476_v28 = vmov (!%p148_p9), 64   ;;  %v364_v29 = vunpack.c.l.bf16 (!%p148_p9), %v1580_v23  ;;  %v365_v30 = vunpack.c.h.bf16 (!%p148_p9), %v1580_v23  ;;  %v368_v31 = vunpack.c.l.bf16 (!%p148_p9), %v1585_v24 }
  0x13   : > { %1254 = vperm.xlu1 (!%p148_p9), %1252, %v1253_v14   ;;  %v1264_v25 = vpack.i.bf16 (!%p148_p9), %v363_v22, %v362_v21  ;;  %v369_v32 = vunpack.c.h.bf16 (!%p148_p9), %v1585_v24  ;;  %v366_v33 = vunpack.c.l.bf16 (!%p148_p9), %v1595_v27  ;;  %v367_v34 = vunpack.c.h.bf16 (!%p148_p9), %v1595_v27 }
  0x14   : > { %v532_v35 = vunpack.c.l.bf16 (!%p148_p9), %v1590_v26  ;;  %v533_v36 = vunpack.c.h.bf16 (!%p148_p9), %v1590_v26  ;;  %v1270_v38 = vpack.i.bf16 (!%p148_p9), %v365_v30, %v364_v29  ;;  %v528_v42 = vunpack.c.l.bf16 (!%p148_p9), %v1608_v37 }
  0x15   : > { %s1554_s26 = scalar_select %p173_p10, %s1522_s16, 1  ;;  %v1280_v39 = vpack.i.bf16 %v369_v32, %v368_v31  ;;  %v1275_v41 = vpack.i.bf16 %v367_v34, %v366_v33  ;;  %v529_v43 = vunpack.c.h.bf16 %v1608_v37  ;;  %v534_v45 = vunpack.c.l.bf16 %v1613_v40 }
  0x16   : > { %1248 = vperm.xlu0 %1241, %v1247_v16   ;;  %v1290_v44 = vpack.i.bf16 %v533_v36, %v532_v35  ;;  %v535_v46 = vunpack.c.h.bf16 %v1613_v40  ;;  %v530_v49 = vunpack.c.l.bf16 %v1622_v47  ;;  %v531_v50 = vunpack.c.h.bf16 %v1622_v47  ;;  %s1480_s16 = smov [#allocation2]  }
  0x17   : > { %s1059_s6 = sshll.u32 %s1554_s26, 3  ;;  %1259 = vperm.xlu1 %1252, %v1258_v18   ;;  %v1285_v48 = vpack.i.bf16 %v529_v43, %v528_v42  ;;  %vm725_vm3 = vcmask 261120   ;;  %vm1479_vm4 = vmmov 0   ;;  %s179_s4 = scalar_lea.vmem %s1726_s1, %s1554_s26 }
  0x18   : > { %s176_s9 = scalar_lea.vmem %s1725_s0, %s1059_s6  ;;  %v1300_v51 = vpack.i.bf16 %v535_v46, %v534_v45  ;;  %v1295_v52 = vpack.i.bf16 %v531_v50, %v530_v49  ;;  %s1058_s6 = sshll.u32 %s170_s5, 1 }
  0x19   : > { %v181_v15 = vld [vmem:[%s176_s9] sm:$0xff]  ;;  %s172_s26 = scalar_lea.vmem [#allocation2], %s1058_s6  ;;  %s1415_s20 = sshll.u32 %s1480_s16, 4  ;;  %s1416_s20 = int_to_ptr.vmem [resolvable:$false] %s1415_s20 }
  0x1a   : > { %v191_v17 = vpack.c.bf16 %v181_v15, %v181_v15  ;;  %1263 = vset.pattern.permute.xlu0 %v1476_v28  ;;  %s986_s8 = sshll.u32 %s172_s26, 4  ;;  %s1417_s24 = scalar_lea.vmem %s1416_s20, 64  ;;  %s1685_s8 = int_to_ptr.vmem [resolvable:$true] %s986_s8 }
  0x1b   : > { %1269 = vset.pattern.permute.xlu1 %v1476_v28  ;;  %1265 = vperm.xlu0 %1263, %v1264_v25   ;;  %s1411_s19 = scalar_lea.vmem %s1685_s8, 32  ;;  %p1418_p0 = scmp.lt.s32.totalorder %s1685_s8, %s1416_s20 }
  0x1c   : > { %1196 = vmatprep.subr.msk.bf16.mxu0 %vm273_vm1, %v191_v17  ;;  %v275_v19 = vsel %vm273_vm1, %v191_v17, 0  ;;  %1271 = vperm.xlu1 %1269, %v1270_v38   ;;  %p1412_p11 = scmp.ne.s32.totalorder %s1685_s8, %s1411_s19  ;;  %p1419_p1 = scmp.lt.s32.totalorder %s1417_s24, %s1411_s19 }
  0x1d   : > { %1131 = vmatpush3.bf16.msra.mxu0 %v275_v19 }
  0x1e   : > { %p1413_p12 = pnand %p1412_p11, %p1539_p5  ;;  %p1420_p2 = por %p1419_p1, %p1418_p0 }
  0x1f   : > { %1281 = vperm.xlu0 %1263, %v1280_v39  }
  0x20   : > { %1133 = vmatmul.mubr.msk.bf16.vlgmr.msra.gmra.mrb[0].mxu0 %vm260_vm0, %v185_v1  ;;  %1276 = vperm.xlu1 %1269, %v1275_v41   ;;  %p1414_p13 = pneg %p1413_p12 }
  0x21   : > { %1136 = vmatprep.mubr.msk.bf16.mxu0 %vm260_vm0, %v187_v2 }
  0x22   : > { %p1421_p3 = pnand %p1420_p2, %p1414_p13 }
  0x23   : > { %1291 = vperm.xlu0 %1263, %v1290_v44  }
  0x24   : > { %1286 = vperm.xlu1 %1269, %v1285_v48  }
  0x27   : > { %1301 = vperm.xlu0 %1263, %v1300_v51  }
  0x28   : > { %1137 = vmatmul.mubr.msk.bf16.gmra.mrb[4].mxu0 %vm260_vm0, %v189_v6  ;;  %1296 = vperm.xlu1 %1269, %v1295_v52  }
  0x29   : > { %1164 = vmatprep.mubr.msk.bf16.mxu0 %vm430_vm2, %v1608_v37 }
  0x91   : > { %v1244_v53 = vpop.permute.xlu0 %1243 }
  0x92   : > { %v1255_v55 = vpop.permute.xlu1 %1254 }
  0x95   : > { %v1249_v54 = vpop.permute.xlu0 %1248 }
  0x96   : > { %v1260_v61 = vpop.permute.xlu1 %1259 }
  0x9a   : > { %v1266_v22 = vpop.permute.xlu0 %1265 }
  0x9b   : > { %v1272_v21 = vpop.permute.xlu1 %1271 }
  0x9e   : > { %v1282_v36 = vpop.permute.xlu0 %1281 }
  0x9f   : > { %v1277_v39 = vpop.permute.xlu1 %1276 }
  0xf3   : > { %v1134_v56 = vpop.f32.mrb[0].mxu0 }
  0xf4   : > { %v1379_v57 = vadd.low.f32.bf16 %v1134_v56, %v1249_v54  ;;  %v311_v58 = vpop.f32.mrb[1].mxu0  ;;  %v685_v56 = vld [vmem:[%s1727_s2 + $0x60] sm:$0xff]  }
  0xf5   : > { %v1380_v59 = vadd.low.f32.bf16 %v311_v58, %v1244_v53  ;;  %v1135_v60 = vpop.f32.mrb[2].mxu0  ;;  %v691_v58 = vunpack.c.l.bf16 %v685_v56 }
  0xf6   : > { %1361 = vtanh.f32 %v1379_v57  ;;  %v1381_v62 = vadd.high.f32.bf16 %v1135_v60, %v1249_v54  ;;  %v314_v63 = vpop.f32.mrb[3].mxu0  ;;  %v1647_v57 = vld [vmem:[%s1727_s2 + $0x68] sm:$0xff]  }
  0xf7   : > { %1363 = vtanh.f32 %v1380_v59  ;;  %v1382_v0 = vadd.high.f32.bf16 %v314_v63, %v1244_v53  ;;  %v1477_v59 = vmov 32   ;;  %v1657_v63 = vld [vmem:[%s1727_s2 + $0x78] sm:$0xff]  }
  0xf8   : > { %1365 = vtanh.f32 %v1381_v62  ;;  %1305 = vset.pattern.permute.xlu1 %v1477_v59  ;;  %1311 = vset.pattern.permute.xlu0 %v1477_v59  ;;  %v694_v62 = vunpack.c.h.bf16 %v1647_v57 }
  0xf9   : > { %1367 = vtanh.f32 %v1382_v0 }
  0xfb   : > { %v1138_v1 = vpop.f32.mrb[4].mxu0 }
  0xfc   : > { %v1383_v2 = vadd.low.f32.bf16 %v1138_v1, %v1260_v61  ;;  %v327_v3 = vpop.f32.mrb[5].mxu0  ;;  %v1662_v1 = vld [vmem:[%s1727_s2 + $0x80] sm:$0xff]  }
  0xfd   : > { %v1384_v4 = vadd.low.f32.bf16 %v327_v3, %v1255_v55  ;;  %v1139_v5 = vpop.f32.mrb[6].mxu0 }
  0xfe   : > { %1369 = vtanh.f32 %v1383_v2  ;;  %v1385_v6 = vadd.high.f32.bf16 %v1139_v5, %v1260_v61  ;;  %v330_v7 = vpop.f32.mrb[7].mxu0  ;;  %v794_v5 = vunpack.c.h.bf16 %v1657_v63 }
  0xff   : > { %1371 = vtanh.f32 %v1384_v4  ;;  %v1386_v8 = vadd.high.f32.bf16 %v330_v7, %v1255_v55  ;;  %v793_v4 = vunpack.c.l.bf16 %v1657_v63 }
 0x100   : > { %v1362_v9 = vpop.eup %1361  ;;  %1373 = vtanh.f32 %v1385_v6  ;;  %v888_v6 = vunpack.c.l.bf16 %v1662_v1 }
 0x101   : > { %v1364_v10 = vpop.eup %1363  ;;  %1375 = vtanh.f32 %v1386_v8  ;;  %v1322_v7 = vpack.i.bf16 %v794_v5, %v793_v4  ;;  %v1287_v8 = vpop.permute.xlu1 %1286 }
 0x102   : > { %v1366_v11 = vpop.eup %1365 }
 0x103   : > { %v1368_v12 = vpop.eup %1367  ;;  %v359_v13 = vpack.c.bf16 %v1366_v11, %v1362_v9  ;;  %v1292_v9 = vpop.permute.xlu0 %1291 }
 0x104   : > { %v358_v14 = vpack.c.bf16 %v1368_v12, %v1364_v10 }
 0x105   : > { %v1297_v12 = vpop.permute.xlu1 %1296 }
 0x106   : > { %1140 = vmatprep.subr.bf16.mxu1 %v358_v14 }
 0x107   : > { %1141 = vmatpush3.bf16.msra.mxu1 %v358_v14 }
 0x108   : > { %v1370_v15 = vpop.eup %1369  ;;  %1142 = vmatprep.subr.bf16.mxu1 %v359_v13 }
 0x109   : > { %v1372_v16 = vpop.eup %1371 }
 0x10a   : > { %v1374_v17 = vpop.eup %1373 }
 0x10b   : > { %v1376_v18 = vpop.eup %1375  ;;  %1143 = vmatpush3.bf16.msra.mxu1 %v359_v13  ;;  %v361_v19 = vpack.c.bf16 %v1374_v17, %v1370_v15  ;;  %v1302_v15 = vpop.permute.xlu0 %1301 }
 0x10c   : > { %v360_v20 = vpack.c.bf16 %v1376_v18, %v1372_v16 }
 0x10e   : > { %1144 = vmatprep.subr.bf16.mxu1 %v360_v20 }
 0x10f   : > { %1145 = vmatpush3.bf16.msra.mxu1 %v360_v20 }
 0x110   : > { %1146 = vmatprep.subr.bf16.mxu1 %v361_v19 }
 0x113   : > { %1147 = vmatpush3.bf16.msra.mxu1 %v361_v19 }
 0x116   : > { %1149 = vmatmul.mubr.msk.bf16.vlgmr.msra.gmra.mrb[0].mxu1 %vm430_vm2, %v1580_v23 }
 0x117   : > { %1152 = vmatprep.mubr.msk.bf16.mxu1 %vm430_vm2, %v1595_v27 }
 0x11e   : > { %1153 = vmatmul.mubr.msk.bf16.gmra.mrb[4].mxu1 %vm430_vm2, %v1585_v24 }
 0x11f   : > { %1176 = vmatprep.mubr.msk.bf16.mxu1 %vm725_vm3, %v685_v56 }
 0x1e9   : > { %v1150_v25 = vpop.f32.mrb[0].mxu1 }
 0x1ea   : > { %v1387_v28 = vadd.low.f32.bf16 %v1150_v25, %v1272_v21  ;;  %v477_v29 = vpop.f32.mrb[1].mxu1 }
 0x1eb   : > { %v1388_v30 = vadd.low.f32.bf16 %v477_v29, %v1266_v22  ;;  %v1151_v31 = vpop.f32.mrb[2].mxu1 }
 0x1ec   : > { %v1389_v32 = vadd.high.f32.bf16 %v1151_v31, %v1272_v21  ;;  %v480_v33 = vpop.f32.mrb[3].mxu1  ;;  %v510_v23 = vmax.f32 %v1387_v28, 0.0 }
 0x1ed   : > { %v1390_v34 = vadd.high.f32.bf16 %v480_v33, %v1266_v22  ;;  %v508_v27 = vmax.f32 %v1388_v30, 0.0 }
 0x1ee   : > { %v511_v35 = vmax.f32 %v1389_v32, 0.0 }
 0x1ef   : > { %v509_v38 = vmax.f32 %v1390_v34, 0.0 }
 0x1f0   : > { %v525_v24 = vpack.c.bf16 %v511_v35, %v510_v23 }
 0x1f1   : > { %v524_v41 = vpack.c.bf16 %v509_v38, %v508_v27  ;;  %v1154_v42 = vpop.f32.mrb[4].mxu1 }
 0x1f2   : > { %v1391_v37 = vadd.low.f32.bf16 %v1154_v42, %v1282_v36  ;;  %v493_v43 = vpop.f32.mrb[5].mxu1 }
 0x1f3   : > { %v1392_v44 = vadd.low.f32.bf16 %v493_v43, %v1277_v39  ;;  %v1155_v45 = vpop.f32.mrb[6].mxu1  ;;  %1156 = vmatprep.subr.bf16.mxu0 %v524_v41 }
 0x1f4   : > { %v1393_v46 = vadd.high.f32.bf16 %v1155_v45, %v1282_v36  ;;  %v496_v48 = vpop.f32.mrb[7].mxu1  ;;  %1157 = vmatpush3.bf16.msra.mxu0 %v524_v41  ;;  %v514_v50 = vmax.f32 %v1391_v37, 0.0 }
 0x1f5   : > { %v1394_v49 = vadd.high.f32.bf16 %v496_v48, %v1277_v39  ;;  %1158 = vmatprep.subr.bf16.mxu0 %v525_v24  ;;  %v512_v52 = vmax.f32 %v1392_v44, 0.0 }
 0x1f6   : > { %v515_v51 = vmax.f32 %v1393_v46, 0.0 }
 0x1f7   : > { %v513_v53 = vmax.f32 %v1394_v49, 0.0 }
 0x1f8   : > { %v527_v54 = vpack.c.bf16 %v515_v51, %v514_v50  ;;  %1159 = vmatpush3.bf16.msra.mxu0 %v525_v24 }
 0x1f9   : > { %v526_v55 = vpack.c.bf16 %v513_v53, %v512_v52 }
 0x1fb   : > { %1160 = vmatprep.subr.bf16.mxu0 %v526_v55 }
 0x1fc   : > { %1161 = vmatpush3.bf16.msra.mxu0 %v526_v55 }
 0x1fd   : > { %1162 = vmatprep.subr.bf16.mxu0 %v527_v54 }
 0x200   : > { %1163 = vmatpush3.bf16.msra.mxu0 %v527_v54 }
 0x203   : > { %1165 = vmatmul.mubr.msk.bf16.vlgmr.msra.gmra.mrb[8].mxu0 %vm430_vm2, %v1622_v47  ;;  %v692_v47 = vunpack.c.h.bf16 %v685_v56 }
 0x204   : > { %1168 = vmatprep.mubr.msk.bf16.mxu0 %vm430_vm2, %v1590_v26  ;;  %v785_v26 = vld [vmem:[%s1727_s2 + $0x70] sm:$0xff]  }
 0x205   : > { %v791_v60 = vunpack.c.l.bf16 %v785_v26  ;;  %v792_v61 = vunpack.c.h.bf16 %v785_v26  ;;  %v1306_v0 = vpack.i.bf16 %v692_v47, %v691_v58 }
 0x207   : > { %1307 = vperm.xlu1 %1305, %v1306_v0   ;;  %v1317_v3 = vpack.i.bf16 %v792_v61, %v791_v60 }
 0x20b   : > { %1169 = vmatmul.mubr.msk.bf16.gmra.mrb[12].mxu0 %vm430_vm2, %v1613_v40  ;;  %v693_v40 = vunpack.c.l.bf16 %v1647_v57  ;;  %1318 = vperm.xlu1 %1305, %v1317_v3  }
 0x20c   : > { %1184 = vmatprep.mubr.msk.bf16.mxu0 %vm725_vm3, %v785_v26 }
 0x20d   : > { %v1312_v2 = vpack.i.bf16 %v694_v62, %v693_v40 }
 0x20f   : > { %1313 = vperm.xlu0 %1311, %v1312_v2   ;;  %1323 = vperm.xlu1 %1305, %v1322_v7  }
 0x213   : > { %892 = vperm.xlu0 %1311, %v888_v6  }
 0x286   : > { %v1308_v45 = vpop.permute.xlu1 %1307 }
 0x28a   : > { %v1319_v26 = vpop.permute.xlu1 %1318 }
 0x28e   : > { %v1314_v44 = vpop.permute.xlu0 %1313  ;;  %v1324_v60 = vpop.permute.xlu1 %1323 }
 0x2d6   : > { %v1166_v10 = vpop.f32.mrb[8].mxu0 }
 0x2d7   : > { %v642_v11 = vpop.f32.mrb[9].mxu0  ;;  %v1395_v16 = vadd.low.f32.bf16 %v1166_v10, %v1297_v12 }
 0x2d8   : > { %v1167_v13 = vpop.f32.mrb[10].mxu0  ;;  %v1396_v17 = vadd.low.f32.bf16 %v642_v11, %v1287_v8 }
 0x2d9   : > { %v645_v14 = vpop.f32.mrb[11].mxu0  ;;  %v1397_v19 = vadd.high.f32.bf16 %v1167_v13, %v1297_v12  ;;  %v675_v29 = vmax.f32 %v1395_v16, 0.0  ;;  %v950_v12 = vlaneseq  ;;  %v182_v13 = vld [vmem:[%s179_s4] sm:$0x1] }
 0x2da   : > { %v1399_v22 = vadd.high.f32.bf16 %v645_v14, %v1287_v8  ;;  %v673_v33 = vmax.f32 %v1396_v17, 0.0 }
 0x2db   : > { %v676_v35 = vmax.f32 %v1397_v19, 0.0  ;;  %v951_v14 = vshrl.u32 %v950_v12, 7 }
 0x2dc   : > { %v674_v38 = vmax.f32 %v1399_v22, 0.0 }
 0x2dd   : > { %v952_v16 = vsub.s32 0, %v951_v14 }
 0x2de   : > { %v1170_v18 = vpop.f32.mrb[12].mxu0 }
 0x2df   : > { %v1398_v20 = vadd.low.f32.bf16 %v1170_v18, %v1302_v15  ;;  %v658_v21 = vpop.f32.mrb[13].mxu0  ;;  %v893_v18 = vpop.permute.xlu0 %892 }
 0x2e0   : > { %v1400_v25 = vadd.low.f32.bf16 %v658_v21, %v1292_v9  ;;  %v1171_v28 = vpop.f32.mrb[14].mxu0 }
 0x2e1   : > { %v679_v30 = vmax.f32 %v1398_v20, 0.0  ;;  %v1401_v31 = vadd.high.f32.bf16 %v1171_v28, %v1302_v15  ;;  %v661_v32 = vpop.f32.mrb[15].mxu0  ;;  %v962_v15 = vmul.f32 %v182_v13, %v182_v13 }
 0x2e2   : > { %v677_v34 = vmax.f32 %v1400_v25, 0.0  ;;  %v1402_v23 = vadd.high.f32.bf16 %v661_v32, %v1292_v9 }
 0x2e3   : > { %v683_v36 = vadd.f32 %v679_v30, %v675_v29  ;;  %v680_v27 = vmax.f32 %v1401_v31, 0.0  ;;  %v963_v17 = vmul.f32 0.5, %v962_v15  ;;  %v953_v31 = vrot.slane %v182_v13, %v952_v16 }
 0x2e4   : > { %v681_v39 = vadd.f32 %v677_v34, %v673_v33  ;;  %v678_v24 = vmax.f32 %v1402_v23, 0.0 }
 0x2e5   : > { %v684_v41 = vadd.f32 %v680_v27, %v676_v35  ;;  %v968_v21 = vrot.slane %v963_v17, %v952_v16 }
 0x2e6   : > { %v682_v42 = vadd.f32 %v678_v24, %v674_v38 }
 0x2e7   : > { %v690_v37 = vpack.c.bf16 %v684_v41, %v683_v36 }
 0x2e8   : > { %v689_v43 = vpack.c.bf16 %v682_v42, %v681_v39 }
 0x2ea   : > { %1172 = vmatprep.subr.bf16.mxu1 %v689_v43 }
 0x2eb   : > { %1173 = vmatpush3.bf16.msra.mxu1 %v689_v43 }
 0x2ec   : > { %1174 = vmatprep.subr.bf16.mxu1 %v690_v37 }
 0x2ef   : > { %1175 = vmatpush3.bf16.msra.mxu1 %v690_v37 }
 0x2f2   : > { %1177 = vmatmul.mubr.msk.bf16.vlgmr.msra.gmra.mrb[8].mxu1 %vm725_vm3, %v1647_v57  ;;  %v1478_v57 = vmov 0.0  }
 0x2f3   : > { %1188 = vmatprep.subr.bf16.mxu1 %v1478_v57  ;;  %1192 = vmatprep.mubr.msk.bf16.mxu1 %vm1479_vm4, %v1478_v57 }
 0x3c5   : > { %v1178_v46 = vpop.f32.mrb[8].mxu1 }
 0x3c6   : > { %v1403_v48 = vadd.low.f32.bf16 %v1178_v46, %v1314_v44  ;;  %v766_v49 = vpop.f32.mrb[9].mxu1 }
 0x3c7   : > { %v1404_v50 = vadd.low.f32.bf16 %v766_v49, %v1308_v45  ;;  %v1179_v51 = vpop.f32.mrb[10].mxu1 }
 0x3c8   : > { %v1405_v52 = vadd.high.f32.bf16 %v1179_v51, %v1314_v44  ;;  %v769_v53 = vpop.f32.mrb[11].mxu1  ;;  %v783_v55 = vmax.f32 %v1403_v48, 0.0 }
 0x3c9   : > { %v1406_v54 = vadd.high.f32.bf16 %v769_v53, %v1308_v45  ;;  %v781_v58 = vmax.f32 %v1404_v50, 0.0 }
 0x3ca   : > { %v784_v56 = vmax.f32 %v1405_v52, 0.0 }
 0x3cb   : > { %v782_v47 = vmax.f32 %v1406_v54, 0.0 }
 0x3cc   : > { %v790_v40 = vpack.c.bf16 %v784_v56, %v783_v55 }
 0x3cd   : > { %v789_v59 = vpack.c.bf16 %v782_v47, %v781_v58 }
 0x3cf   : > { %1180 = vmatprep.subr.bf16.mxu0 %v789_v59 }
 0x3d0   : > { %1181 = vmatpush3.bf16.msra.mxu0 %v789_v59 }
 0x3d1   : > { %1182 = vmatprep.subr.bf16.mxu0 %v790_v40 }
 0x3d4   : > { %1183 = vmatpush3.bf16.msra.mxu0 %v790_v40 }
 0x3d7   : > { %1185 = vmatmul.mubr.msk.bf16.vlgmr.msra.gmra.mrb[16].mxu0 %vm725_vm3, %v1657_v63 }
 0x4aa   : > { %v1186_v61 = vpop.f32.mrb[16].mxu0 }
 0x4ab   : > { %v1407_v62 = vadd.low.f32.bf16 %v1186_v61, %v1324_v60  ;;  %v865_v0 = vpop.f32.mrb[17].mxu0 }
 0x4ac   : > { %v1408_v2 = vadd.low.f32.bf16 %v865_v0, %v1319_v26  ;;  %v1187_v3 = vpop.f32.mrb[18].mxu0 }
 0x4ad   : > { %v1409_v4 = vadd.high.f32.bf16 %v1187_v3, %v1324_v60  ;;  %v868_v5 = vpop.f32.mrb[19].mxu0  ;;  %v882_v7 = vmax.f32 %v1407_v62, 0.0 }
 0x4ae   : > { %v1410_v6 = vadd.high.f32.bf16 %v868_v5, %v1319_v26  ;;  %v880_v9 = vmax.f32 %v1408_v2, 0.0 }
 0x4af   : > { %v883_v8 = vmax.f32 %v1409_v4, 0.0 }
 0x4b0   : > { %v881_v63 = vmax.f32 %v1410_v6, 0.0 }
 0x4b1   : > { %v887_v10 = vpack.c.bf16 %v883_v8, %v882_v7 }
 0x4b2   : > { %v886_v11 = vpack.c.bf16 %v881_v63, %v880_v9 }
 0x4b4   : > { %1189 = vmatpush3.bf16.msra.mxu1 %v886_v11 }
 0x4b5   : > { %1190 = vmatprep.subr.bf16.mxu1 %v1478_v57 }
 0x4b8   : > { %1191 = vmatpush3.bf16.msra.mxu1 %v887_v10 }
 0x4bb   : > { %1193 = vmatmul.mubr.msk.bf16.vlgmr.msra.gmra.mrb[12].mxu1 %vm725_vm3, %v1662_v1 }
 0x58e   : > { %v941_v19 = vpop.f32.mrb[12].mxu1 }
 0x58f   : > { %v942_v20 = vadd.f32 %v941_v19, %v893_v18  ;;  %v1194_v22 = vpop.f32.mrb[13].mxu1 }
 0x590   : > { %v944_v25 = vpop.f32.mrb[14].mxu1 }
 0x591   : > { %v947_v1 = vmul.f32 1.442695, %v942_v20  ;;  %v961_v28 = vsub.f32 0.0, %v942_v20  ;;  %v1195_v29 = vpop.f32.mrb[15].mxu1 }
 0x593   : > { %1377 = vpow2.f32 %v947_v1  ;;  %v970_v30 = vsub.f32 %v961_v28, %v968_v21 }
 0x595   : > { %971 = vst [vmem:[%s172_s26] sm:$0x2] %v970_v30 }
 0x59d   : > { %v1378_v32 = vpop.eup %1377 }
 0x59e   : > { %v955_v33 = vmul.f32 %v1378_v32, %v953_v31 }
 0x5a0   : > { %v957_v34 = vrot.slane %v955_v33, 1 }
 0x5a2   : > { %v959_v23 = vadd.f32 %v957_v34, %v942_v20 }
 0x5a4   : > { %960 = vst [vmem:[%s172_s26] sm:$0x1] %v959_v23 }
 0x5a5   : > { %1424 = shalt.err (!%p1421_p3)
}
 0x5a6   : > { %s1425_s25 = scalar_lea.hbm %s1683_s11, 32  ;;  %s1429_s29 = scalar_lea.hbm %s1728_s3, 64 }
 0x5a7   : > { %p1426_p4 = scmp.ne.s32.totalorder %s1683_s11, %s1425_s25  ;;  %p1430_p9 = scmp.lt.u32.totalorder %s1683_s11, %s1728_s3 }
 0x5a8   : > { %p1431_p10 = scmp.lt.u32.totalorder %s1429_s29, %s1425_s25  ;;  %p1433_p12 = scmp.lt.u32.totalorder %s1425_s25, %s1683_s11 }
 0x5a9   : > { %p1427_p7 = pnand %p1426_p4, %p1539_p5 }
 0x5aa   : > { %p1432_p11 = por %p1431_p10, %p1430_p9 }
 0x5ab   : > { %p1428_p8 = pneg %p1427_p7 }
 0x5ac   : > { %p1434_p13 = por %p1433_p12, %p1432_p11 }
 0x5ae   : > { %p1435_p0 = pnand %p1434_p13, %p1428_p8 }
 0x5b0   : > { %1438 = shalt.err (!%p1435_p0)
}
 0x5b1   : > { %1197 = dma.vmem_to_hbm [thread:$0]  (%p1539_p5), %s1685_s8, 32, %s1683_s11, %s973_s17  }
 0x5b2 PF: > { %p1203_p1 = scmp.ge.s32.totalorder %s1473_s15, 2  ;;  %s998_s5 = sand.u32 1, %s1461_s12  }
 0x5b3   : > { %s999_s6 = scalar_lea.sflag [#allocation3], %s998_s5 }
 0x5b4   : > { %p1200_p2 = pnand %p1203_p1, %p1543_p6 }
 0x5b6   : > { %1456 = dma.done.wait (!%p1200_p2), %s999_s6, 32  }
 0x5b7   : > { %1458 = vsyncadd (!%p1200_p2), %s999_s6, 4294967264  ;;  %p13_p3 = scmp.ge.s32.totalorder %s1526_s18, 4   ;;  %s1731_s12 = smov %s1465_s13 }
 0x5b8   : > { %s1732_s13 = smov %s1469_s14  ;;  %s1733_s14 = smov %s1537_s21 }
 0x5b9   : > { %s1734_s15 = smov %s1526_s18  ;;  %15 = sbr.rel (!%p13_p3) target bundleno = 3 (0x3), region = 70 }
 0x5c0   :  { %1004 = vsyncpa [#allocation3], 1 }
 0x5c1   :  { %1006 = vsyncpa [#allocation3 + $0x1], 1 }

</bundles_post_ra>
